<compile_context>
chip_gen: v6e
topology: v6e:2x2x1
jax: 0.10.0
libtpu: 0.0.40
codegen_flags: <defaults>
</compile_context>

<pallas_src>
import functools

import jax
import jax.numpy as jnp
from jax import lax
from jax.experimental import pallas as pl
from jax.experimental.pallas import tpu as pltpu


LANE_PAD = 128          # pad every feature dim to a full 128-lane vreg width
MAX_BATCH_BLOCK = 256   # cap batch tile (~32 vregs of live f32 activation)
BATCH_ALIGN = 16        # bf16 sublane packing: 16 rows per vreg


# ----------------------------------------------------------------------------
# Fused MLP kernel: x -> (Linear -> ReLU)*H -> Linear, all inside one body.
# refs = (w0, b0, w1, b1, ..., w_{L-1}, b_{L-1}, o_ref)
# ----------------------------------------------------------------------------
def _mlp_kernel(x_ref, *refs, num_layers: int):
    o_ref = refs[-1]
    h = x_ref[...]                                        # (BM, 128) bf16
    for i in range(num_layers):
        w = refs[2 * i][...]                              # (128, 128) bf16
        b = refs[2 * i + 1][...]                          # (1, 128)   f32
        # bf16 x bf16 on the MXU, f32 accumulation; bias added in f32 (VPU).
        h32 = jnp.dot(h, w, preferred_element_type=jnp.float32) + b
        if i < num_layers - 1:
            # Fused ReLU, then back to bf16 so the next matmul stays MXU-native.
            h = jnp.maximum(h32, 0.0).astype(jnp.bfloat16)
        else:
            h = h32                                       # final logits in f32
    o_ref[...] = h.astype(o_ref.dtype)


def _fused_mlp(x_pad: jax.Array, flat_params, num_layers: int,
               block: int) -> jax.Array:
    """x_pad: (B_pad, LANE_PAD) bf16 with B_pad a multiple of `block`."""
    B_pad = x_pad.shape[0]
    grid = (B_pad // block,)

    in_specs = [pl.BlockSpec((block, LANE_PAD), lambda i: (i, 0))]
    for _ in range(num_layers):
        # Constant block index -> weights/biases stay resident in VMEM across
        # all batch tiles.  (Use pipeline_mode=pl.Buffered(1) here if layers
        # ever get wide enough for double-buffering to matter for VMEM.)
        in_specs.append(pl.BlockSpec((LANE_PAD, LANE_PAD), lambda i: (0, 0)))
        in_specs.append(pl.BlockSpec((1, LANE_PAD), lambda i: (0, 0)))

    return pl.pallas_call(
        functools.partial(_mlp_kernel, num_layers=num_layers),
        out_shape=jax.ShapeDtypeStruct((B_pad, LANE_PAD), jnp.float32),
        grid=grid,
        in_specs=in_specs,
        out_specs=pl.BlockSpec((block, LANE_PAD), lambda i: (i, 0)),
        compiler_params=pltpu.CompilerParams(
            dimension_semantics=("parallel",)),   # megacore sharding on v7x
    )(x_pad, *flat_params)


# ----------------------------------------------------------------------------
# Parameter init (mimics torch.nn.Linear default U(-1/sqrt(fan_in), +bound)),
# transposed to (in, out), zero-padded to (128, 128) bf16 / (1, 128) f32.
# ----------------------------------------------------------------------------
def init_actor_params(key, state_size: int, action_size: int,
                      hidden_layers: tuple):
    dims = [state_size, *hidden_layers, action_size]
    layers = []
    for i in range(len(dims) - 1):
        fan_in, fan_out = dims[i], dims[i + 1]
        key, kw, kb = jax.random.split(key, 3)
        bound = float(fan_in) ** -0.5
        w_t = jax.random.uniform(kw, (fan_in, fan_out), jnp.float32,
                                 minval=-bound, maxval=bound)
        b = jax.random.uniform(kb, (fan_out,), jnp.float32,
                               minval=-bound, maxval=bound)
        # Pad once at init so kernel operands are lane/sublane dense.
        w_pad = jnp.zeros((LANE_PAD, LANE_PAD), jnp.bfloat16)
        w_pad = w_pad.at[:fan_in, :fan_out].set(w_t.astype(jnp.bfloat16))
        b_pad = jnp.zeros((1, LANE_PAD), jnp.float32)
        b_pad = b_pad.at[0, :fan_out].set(b)
        layers.append((w_pad, b_pad, fan_in, fan_out))
    return {"layers": layers, "dims": dims,
            "state_size": state_size, "action_size": action_size}


def _choose_batch_tiling(B: int):
    """Pick (block, B_pad): single step for small B, 256-row tiles for big B."""
    B_align = int(pl.cdiv(B, BATCH_ALIGN)) * BATCH_ALIGN
    if B_align <= MAX_BATCH_BLOCK:
        return B_align, B_align                 # grid=(1,): no per-step overhead
    block = MAX_BATCH_BLOCK
    return block, int(pl.cdiv(B, block)) * block   # >=2 parallel steps (v7x)


# ----------------------------------------------------------------------------
# ActorNetwork.forward: state -> action logits (softmax applied outside).
# ----------------------------------------------------------------------------
def actor_forward(params, state: jax.Array) -> jax.Array:
    x = jnp.asarray(state, jnp.float32)
    if x.ndim == 1:                      # mirror state.unsqueeze(0)
        x = x[None, :]
    B, Din = x.shape
    assert Din == params["state_size"]

    block, B_pad = _choose_batch_tiling(B)
    # Single pad op (cast + pad); callers with pre-padded buffers can skip it.
    x_pad = jnp.pad(x.astype(jnp.bfloat16),
                    ((0, B_pad - B), (0, LANE_PAD - Din)))

    flat_params = []
    for (w_pad, b_pad, _, _) in params["layers"]:
        flat_params.extend((w_pad, b_pad))

    out_pad = _fused_mlp(x_pad, flat_params,
                         num_layers=len(params["layers"]), block=block)
    # Single slice back to the logical shape.
    return lax.slice(out_pad, (0, 0), (B, params["action_size"]))


# ----------------------------------------------------------------------------
# Demo / self-test
# ----------------------------------------------------------------------------
if __name__ == "__main__":
    state_size = 16
    action_size = 4
    hidden_layers = (32, 32)
    batch = 2

    key = jax.random.PRNGKey(0)
    key_params, key_state = jax.random.split(key)

    params = init_actor_params(key_params, state_size, action_size, hidden_layers)
    state = jax.random.normal(key_state, (batch, state_size), dtype=jnp.float32)

    logits = actor_forward(params, state)
    logits = jax.block_until_ready(logits)

    # Reference in plain JAX mimicking the kernel's dtype pipeline
    # (bf16 operands, f32 accumulation, bf16 re-rounding between layers).
    ref = state.astype(jnp.bfloat16).astype(jnp.float32)
    n = len(params["layers"])
    for i, (w_pad, b_pad, fan_in, fan_out) in enumerate(params["layers"]):
        ref = ref @ w_pad[:fan_in, :fan_out].astype(jnp.float32) + b_pad[0, :fan_out]
        if i < n - 1:
            ref = jnp.maximum(ref, 0.0).astype(jnp.bfloat16).astype(jnp.float32)

    assert logits.shape == (batch, action_size)
    assert jnp.allclose(logits, ref, atol=2e-2, rtol=2e-2)

    print("KERNEL_OK")
</pallas_src>

<mosaic_0001>
module attributes {stable_mosaic.version = 11 : i64} {
  func.func @_mlp_kernel(%arg0: i32, %arg1: memref<16x128xbf16, #tpu.memory_space<vmem>>, %arg2: memref<128x128xbf16, #tpu.memory_space<vmem>>, %arg3: memref<1x128xf32, #tpu.memory_space<vmem>>, %arg4: memref<128x128xbf16, #tpu.memory_space<vmem>>, %arg5: memref<1x128xf32, #tpu.memory_space<vmem>>, %arg6: memref<128x128xbf16, #tpu.memory_space<vmem>>, %arg7: memref<1x128xf32, #tpu.memory_space<vmem>>, %arg8: memref<16x128xf32, #tpu.memory_space<vmem>>) attributes {dimension_semantics = [#tpu.dimension_semantics<parallel>], iteration_bounds = array<i64: 1>, scalar_prefetch = 0 : i64, scratch_operands = 0 : i64, tpu.core_type = #tpu.core_type<tc>, window_params = [{transform_indices = @transform_0, window_bounds = array<i64: 16, 128>}, {pipeline_mode = #tpu.pipeline_mode<synchronous>, transform_indices = @transform_1, window_bounds = array<i64: 128, 128>}, {pipeline_mode = #tpu.pipeline_mode<synchronous>, transform_indices = @transform_2, window_bounds = array<i64: 1, 128>}, {pipeline_mode = #tpu.pipeline_mode<synchronous>, transform_indices = @transform_3, window_bounds = array<i64: 128, 128>}, {pipeline_mode = #tpu.pipeline_mode<synchronous>, transform_indices = @transform_4, window_bounds = array<i64: 1, 128>}, {pipeline_mode = #tpu.pipeline_mode<synchronous>, transform_indices = @transform_5, window_bounds = array<i64: 128, 128>}, {pipeline_mode = #tpu.pipeline_mode<synchronous>, transform_indices = @transform_6, window_bounds = array<i64: 1, 128>}, {transform_indices = @transform_7, window_bounds = array<i64: 16, 128>}]} {
    %c0 = arith.constant 0 : index
    %c0_0 = arith.constant 0 : index
    %0 = vector.load %arg1[%c0, %c0_0] : memref<16x128xbf16, #tpu.memory_space<vmem>>, vector<16x128xbf16>
    %c0_1 = arith.constant 0 : index
    %c0_2 = arith.constant 0 : index
    %1 = vector.load %arg2[%c0_1, %c0_2] : memref<128x128xbf16, #tpu.memory_space<vmem>>, vector<128x128xbf16>
    %c0_3 = arith.constant 0 : index
    %c0_4 = arith.constant 0 : index
    %2 = vector.load %arg3[%c0_3, %c0_4] : memref<1x128xf32, #tpu.memory_space<vmem>>, vector<1x128xf32>
    %cst = arith.constant dense<0.000000e+00> : vector<16x128xf32>
    %3 = tpu.matmul %0, %1, %cst {dimension_numbers = #tpu.dot_dimension_numbers<[1], [0], [0], [1], [0, 0, 1, 1], [], []>} : vector<16x128xbf16>, vector<128x128xbf16>, vector<16x128xf32> -> vector<16x128xf32>
    %4 = vector.broadcast %2 : vector<1x128xf32> to vector<16x128xf32>
    %5 = arith.addf %3, %4 : vector<16x128xf32>
    %cst_5 = arith.constant 0.000000e+00 : f32
    %6 = vector.broadcast %cst_5 : f32 to vector<16x128xf32>
    %7 = arith.maximumf %5, %6 : vector<16x128xf32>
    %8 = arith.truncf %7 : vector<16x128xf32> to vector<16x128xbf16>
    %c0_6 = arith.constant 0 : index
    %c0_7 = arith.constant 0 : index
    %9 = vector.load %arg4[%c0_6, %c0_7] : memref<128x128xbf16, #tpu.memory_space<vmem>>, vector<128x128xbf16>
    %c0_8 = arith.constant 0 : index
    %c0_9 = arith.constant 0 : index
    %10 = vector.load %arg5[%c0_8, %c0_9] : memref<1x128xf32, #tpu.memory_space<vmem>>, vector<1x128xf32>
    %cst_10 = arith.constant dense<0.000000e+00> : vector<16x128xf32>
    %11 = tpu.matmul %8, %9, %cst_10 {dimension_numbers = #tpu.dot_dimension_numbers<[1], [0], [0], [1], [0, 0, 1, 1], [], []>} : vector<16x128xbf16>, vector<128x128xbf16>, vector<16x128xf32> -> vector<16x128xf32>
    %12 = vector.broadcast %10 : vector<1x128xf32> to vector<16x128xf32>
    %13 = arith.addf %11, %12 : vector<16x128xf32>
    %cst_11 = arith.constant 0.000000e+00 : f32
    %14 = vector.broadcast %cst_11 : f32 to vector<16x128xf32>
    %15 = arith.maximumf %13, %14 : vector<16x128xf32>
    %16 = arith.truncf %15 : vector<16x128xf32> to vector<16x128xbf16>
    %c0_12 = arith.constant 0 : index
    %c0_13 = arith.constant 0 : index
    %17 = vector.load %arg6[%c0_12, %c0_13] : memref<128x128xbf16, #tpu.memory_space<vmem>>, vector<128x128xbf16>
    %c0_14 = arith.constant 0 : index
    %c0_15 = arith.constant 0 : index
    %18 = vector.load %arg7[%c0_14, %c0_15] : memref<1x128xf32, #tpu.memory_space<vmem>>, vector<1x128xf32>
    %cst_16 = arith.constant dense<0.000000e+00> : vector<16x128xf32>
    %19 = tpu.matmul %16, %17, %cst_16 {dimension_numbers = #tpu.dot_dimension_numbers<[1], [0], [0], [1], [0, 0, 1, 1], [], []>} : vector<16x128xbf16>, vector<128x128xbf16>, vector<16x128xf32> -> vector<16x128xf32>
    %20 = vector.broadcast %18 : vector<1x128xf32> to vector<16x128xf32>
    %21 = arith.addf %19, %20 : vector<16x128xf32>
    %c0_17 = arith.constant 0 : index
    %c0_18 = arith.constant 0 : index
    %22 = vector.load %arg8[%c0_17, %c0_18] : memref<16x128xf32, #tpu.memory_space<vmem>>, vector<16x128xf32>
    tpu.vector_store %arg8[%c0_17, %c0_18], %21 {strides = array<i32>} : memref<16x128xf32, #tpu.memory_space<vmem>>, vector<16x128xf32>,
    return
  }
  func.func @transform_0(%arg0: i32) -> (i32, i32) {
    %c0_i32 = arith.constant 0 : i32
    %c0_i32_0 = arith.constant 0 : i32
    return %arg0, %c0_i32 : i32, i32
  }
  func.func @transform_1(%arg0: i32) -> (i32, i32) {
    %c0_i32 = arith.constant 0 : i32
    %c0_i32_0 = arith.constant 0 : i32
    %c0_i32_1 = arith.constant 0 : i32
    return %c0_i32, %c0_i32_0 : i32, i32
  }
  func.func @transform_2(%arg0: i32) -> (i32, i32) {
    %c0_i32 = arith.constant 0 : i32
    %c0_i32_0 = arith.constant 0 : i32
    %c0_i32_1 = arith.constant 0 : i32
    return %c0_i32, %c0_i32_0 : i32, i32
  }
  func.func @transform_3(%arg0: i32) -> (i32, i32) {
    %c0_i32 = arith.constant 0 : i32
    %c0_i32_0 = arith.constant 0 : i32
    %c0_i32_1 = arith.constant 0 : i32
    return %c0_i32, %c0_i32_0 : i32, i32
  }
  func.func @transform_4(%arg0: i32) -> (i32, i32) {
    %c0_i32 = arith.constant 0 : i32
    %c0_i32_0 = arith.constant 0 : i32
    %c0_i32_1 = arith.constant 0 : i32
    return %c0_i32, %c0_i32_0 : i32, i32
  }
  func.func @transform_5(%arg0: i32) -> (i32, i32) {
    %c0_i32 = arith.constant 0 : i32
    %c0_i32_0 = arith.constant 0 : i32
    %c0_i32_1 = arith.constant 0 : i32
    return %c0_i32, %c0_i32_0 : i32, i32
  }
  func.func @transform_6(%arg0: i32) -> (i32, i32) {
    %c0_i32 = arith.constant 0 : i32
    %c0_i32_0 = arith.constant 0 : i32
    %c0_i32_1 = arith.constant 0 : i32
    return %c0_i32, %c0_i32_0 : i32, i32
  }
  func.func @transform_7(%arg0: i32) -> (i32, i32) {
    %c0_i32 = arith.constant 0 : i32
    %c0_i32_0 = arith.constant 0 : i32
    return %arg0, %c0_i32 : i32, i32
  }
}

</mosaic_0001>

<bundles_post_ra>
// kernel: tpu_custom_call.1
= control target key start
LH: loop header
LB: loop body
LE: loop exit
PB: predicated region body
PF: predicated region fallthrough
CT: control target
= control target key end

     0   :  { %12 = vsyncpa [#allocation3], 0  ;;  %s830_s0 = inlined_call_operand.hbm [shape: bf16[16,128], index: 0, kind: input, shape index: {}]   ;;  %s831_s1 = inlined_call_operand.hbm [shape: bf16[128,128], index: 1, kind: input, shape index: {}]   ;;  %s832_s2 = inlined_call_operand.vmem [shape: f32[1,128], index: 2, kind: input, shape index: {}]   ;;  %s833_s3 = inlined_call_operand.hbm [shape: bf16[128,128], index: 3, kind: input, shape index: {}]   ;;  %s834_s4 = inlined_call_operand.vmem [shape: f32[1,128], index: 4, kind: input, shape index: {}]   ;;  %s835_s5 = inlined_call_operand.hbm [shape: bf16[128,128], index: 5, kind: input, shape index: {}]   ;;  %s836_s6 = inlined_call_operand.vmem [shape: f32[1,128], index: 6, kind: input, shape index: {}]   ;;  %s837_s7 = inlined_call_operand.hbm [shape: f32[16,128], index: 7, kind: output, shape index: {}]  }
   0x1   :  { %13 = vsyncpa [#allocation6], 0 }
   0x2   :  { %14 = vsyncpa [#allocation9], 0 }
   0x3   :  { %15 = vsyncpa [#allocation4], 0  ;;  %s713_s24 = smov [#allocation5]   ;;  %s714_s26 = smov [#allocation2]  }
   0x4   :  { %s33_s25 = sshll.u32 %s713_s24, 4  ;;  %s21_s27 = sshll.u32 %s714_s26, 4  ;;  %s34_s25 = int_to_ptr.vmem [resolvable:$true] %s33_s25  ;;  %s22_s27 = int_to_ptr.vmem [resolvable:$true] %s21_s27 }
   0x5   :  { %s613_s28 = scalar_lea.vmem %s34_s25, 1024  ;;  %p618_p1 = scmp.lt.s32.totalorder %s34_s25, %s34_s25 }
   0x6   :  { %p614_p0 = scmp.ne.s32.totalorder %s34_s25, %s613_s28  ;;  %p619_p2 = scmp.lt.s32.totalorder %s613_s28, %s613_s28 }
   0x8   :  { %p620_p3 = por %p619_p2, %p618_p1 }
   0xa   :  { %p621_p4 = pnand %p620_p3, %p614_p0 }
   0xc   :  { %624 = shalt.err (!%p621_p4)
}
   0xd   :  { %s715_s29 = smov 64   ;;  %s716_s30 = smov 4  }
   0xe   :  { %39 = dma.hbm_to_vmem [thread:$0]  %s831_s1, 1024, %s34_s25, [#allocation6], %s715_s29, %s715_s29, %s716_s30  }
   0xf   :  { %s633_s10 = scalar_lea.vmem %s22_s27, 128  ;;  %p638_p6 = scmp.lt.s32.totalorder %s22_s27, %s22_s27 }
  0x10   :  { %p634_p5 = scmp.ne.s32.totalorder %s22_s27, %s633_s10  ;;  %p639_p7 = scmp.lt.s32.totalorder %s633_s10, %s633_s10 }
  0x12   :  { %p640_p8 = por %p639_p7, %p638_p6 }
  0x14   :  { %p641_p9 = pnand %p640_p8, %p634_p5 }
  0x16   :  { %644 = shalt.err (!%p641_p9)
}
  0x17   :  { %27 = dma.hbm_to_vmem [thread:$0]  %s830_s0, 128, %s22_s27, [#allocation3], %s715_s29, %s715_s29, %s716_s30  }
  0x18   :  { %s717_s13 = smov [#allocation7]   ;;  %s718_s15 = smov [#allocation8]  }
  0x19   :  { %s47_s14 = sshll.u32 %s717_s13, 4  ;;  %s61_s16 = sshll.u32 %s718_s15, 4  ;;  %s48_s14 = int_to_ptr.vmem [resolvable:$true] %s47_s14  ;;  %s62_s16 = int_to_ptr.vmem [resolvable:$true] %s61_s16 }
  0x1a   :  { %s653_s1 = scalar_lea.vmem %s48_s14, 1024  ;;  %p658_p11 = scmp.lt.s32.totalorder %s48_s14, %s48_s14 }
  0x1b   :  { %p654_p10 = scmp.ne.s32.totalorder %s48_s14, %s653_s1  ;;  %p659_p12 = scmp.lt.s32.totalorder %s653_s1, %s653_s1 }
  0x1d   :  { %p660_p13 = por %p659_p12, %p658_p11 }
  0x1f   :  { %p661_p0 = pnand %p660_p13, %p654_p10 }
  0x21   :  { %664 = shalt.err (!%p661_p0)
}
  0x22   :  { %53 = dma.hbm_to_vmem [thread:$0]  %s833_s3, 1024, %s48_s14, [#allocation6], %s715_s29, %s715_s29, %s716_s30  }
  0x23   :  { %s673_s0 = scalar_lea.vmem %s62_s16, 1024  ;;  %p678_p2 = scmp.lt.s32.totalorder %s62_s16, %s62_s16 }
  0x24   :  { %p674_p1 = scmp.ne.s32.totalorder %s62_s16, %s673_s0  ;;  %p679_p3 = scmp.lt.s32.totalorder %s673_s0, %s673_s0 }
  0x26   :  { %p680_p4 = por %p679_p3, %p678_p2 }
  0x28   :  { %p681_p5 = pnand %p680_p4, %p674_p1 }
  0x2a   :  { %684 = shalt.err (!%p681_p5)
}
  0x2b   :  { %67 = dma.hbm_to_vmem [thread:$0]  %s835_s5, 1024, %s62_s16, [#allocation9], %s715_s29, %s715_s29, %s716_s30  }
  0x2c   :  { %705 = dma.done.wait [#allocation3], 128  }
  0x2d   :  { %706 = vsyncadd [#allocation3], 4294967168 }
  0x2e   :  { %707 = dma.done.wait [#allocation6], 2048  }
  0x2f   :  { %708 = vsyncadd [#allocation6], 4294965248 }
  0x30   :  { %709 = dma.done.wait [#allocation9], 1024  }
  0x31   :  { %710 = vsyncadd [#allocation9], 4294966272  ;;  %v719_v0 = vmov 0.0   ;;  %vm720_vm0 = vmmov 0   ;;  %v580_v1 = vld [vmem:[#allocation5 + $0x38] sm:$0xff]   ;;  %v581_v2 = vld [vmem:[#allocation5 + $0x30] sm:$0xff]  }
  0x32   :  { %509 = vmatprep.subr.bf16.mxu0 %v719_v0  ;;  %525 = vmatprep.mubr.msk.bf16.mxu0 %vm720_vm0, %v719_v0  ;;  %v582_v3 = vld [vmem:[#allocation5 + $0x28] sm:$0xff]   ;;  %v589_v4 = vld [vmem:[#allocation7 + $0x38] sm:$0xff]   ;;  %v583_v5 = vld [vmem:[#allocation5 + $0x20] sm:$0xff]   ;;  %s721_s24 = smov [#allocation10]  }
  0x33   :  { %529 = vmatprep.subr.bf16.mxu1 %v719_v0  ;;  %545 = vmatprep.mubr.msk.bf16.mxu1 %vm720_vm0, %v719_v0  ;;  %v590_v6 = vld [vmem:[#allocation7 + $0x30] sm:$0xff]   ;;  %v584_v7 = vld [vmem:[#allocation5 + $0x18] sm:$0xff]   ;;  %v591_v8 = vld [vmem:[#allocation7 + $0x28] sm:$0xff]   ;;  %s440_s25 = sshll.u32 %s721_s24, 4  ;;  %s441_s25 = int_to_ptr.vmem [resolvable:$true] %s440_s25 }
  0x34   :  { %510 = vmatpush3.bf16.msra.mxu0 %v580_v1  ;;  %530 = vmatpush3.bf16.msra.mxu1 %v589_v4  ;;  %v585_v9 = vld [vmem:[#allocation5 + $0x10] sm:$0xff]   ;;  %v592_v10 = vld [vmem:[#allocation7 + $0x20] sm:$0xff]   ;;  %v586_v11 = vld [vmem:[#allocation5 + $0x8] sm:$0xff]   ;;  %p690_p7 = scmp.lt.s32.totalorder %s441_s25, %s441_s25 }
  0x35   :  { %511 = vmatprep.subr.bf16.mxu0 %v719_v0  ;;  %531 = vmatprep.subr.bf16.mxu1 %v719_v0  ;;  %v593_v12 = vld [vmem:[#allocation7 + $0x18] sm:$0xff]   ;;  %v587_v13 = vld [vmem:[#allocation5] sm:$0xff]   ;;  %v594_v15 = vld [vmem:[#allocation7 + $0x10] sm:$0xff]  }
  0x36   :  { %v588_v14 = vld [vmem:[#allocation2] sm:$0xff]   ;;  %v595_v16 = vld [vmem:[#allocation7 + $0x8] sm:$0xff]   ;;  %v596_v17 = vld [vmem:[#allocation7] sm:$0xff]  }
  0x37   :  { %v597_v18 = vld [vmem:[#allocation8 + $0x38] sm:$0xff]   ;;  %v598_v19 = vld [vmem:[#allocation8 + $0x30] sm:$0xff]   ;;  %v599_v20 = vld [vmem:[#allocation8 + $0x28] sm:$0xff]  }
  0x38   :  { %512 = vmatpush3.bf16.msra.mxu0 %v581_v2  ;;  %532 = vmatpush3.bf16.msra.mxu1 %v590_v6  ;;  %v600_v21 = vld [vmem:[#allocation8 + $0x20] sm:$0xff]   ;;  %v601_v22 = vld [vmem:[#allocation8 + $0x18] sm:$0xff]   ;;  %v602_v33 = vld [vmem:[#allocation8 + $0x10] sm:$0xff]  }
  0x39   :  { %513 = vmatprep.subr.bf16.mxu0 %v719_v0  ;;  %533 = vmatprep.subr.bf16.mxu1 %v719_v0  ;;  %v454_v23 = vld [vmem:[%s832_s2] ss:$0 sm:$0xff]  ;;  %v603_v34 = vld [vmem:[#allocation8 + $0x8] sm:$0xff]   ;;  %v604_v35 = vld [vmem:[#allocation8] sm:$0xff]  }
  0x3a   :  { %v464_v36 = vld [vmem:[%s834_s4] ss:$0 sm:$0xff]  ;;  %s685_s4 = scalar_lea.vmem %s441_s25, 256 }
  0x3b   :  { %v473_v46 = vld [vmem:[%s836_s6] ss:$0 sm:$0xff]  ;;  %p686_p6 = scmp.ne.s32.totalorder %s441_s25, %s685_s4  ;;  %p691_p8 = scmp.lt.s32.totalorder %s685_s4, %s685_s4 }
  0x3c   :  { %514 = vmatpush3.bf16.msra.mxu0 %v582_v3  ;;  %534 = vmatpush3.bf16.msra.mxu1 %v591_v8 }
  0x3d   :  { %515 = vmatprep.subr.bf16.mxu0 %v719_v0  ;;  %535 = vmatprep.subr.bf16.mxu1 %v719_v0  ;;  %p692_p9 = por %p691_p8, %p690_p7 }
  0x3f   :  { %p693_p10 = pnand %p692_p9, %p686_p6 }
  0x40   :  { %516 = vmatpush3.bf16.msra.mxu0 %v583_v5  ;;  %536 = vmatpush3.bf16.msra.mxu1 %v592_v10 }
  0x41   :  { %517 = vmatprep.subr.bf16.mxu0 %v719_v0  ;;  %537 = vmatprep.subr.bf16.mxu1 %v719_v0 }
  0x44   :  { %518 = vmatpush3.bf16.msra.mxu0 %v584_v7  ;;  %538 = vmatpush3.bf16.msra.mxu1 %v593_v12 }
  0x45   :  { %519 = vmatprep.subr.bf16.mxu0 %v719_v0  ;;  %539 = vmatprep.subr.bf16.mxu1 %v719_v0 }
  0x48   :  { %520 = vmatpush3.bf16.msra.mxu0 %v585_v9  ;;  %540 = vmatpush3.bf16.msra.mxu1 %v594_v15 }
  0x49   :  { %521 = vmatprep.subr.bf16.mxu0 %v719_v0  ;;  %541 = vmatprep.subr.bf16.mxu1 %v719_v0 }
  0x4c   :  { %522 = vmatpush3.bf16.msra.mxu0 %v586_v11  ;;  %542 = vmatpush3.bf16.msra.mxu1 %v595_v16 }
  0x4d   :  { %523 = vmatprep.subr.bf16.mxu0 %v719_v0  ;;  %543 = vmatprep.subr.bf16.mxu1 %v719_v0 }
  0x50   :  { %524 = vmatpush3.bf16.msra.mxu0 %v587_v13  ;;  %544 = vmatpush3.bf16.msra.mxu1 %v596_v17 }
  0x51   :  { %549 = vmatprep.subr.bf16.mxu0 %v719_v0 }
  0x53   :  { %526 = vmatmul.mubr.bf16.vlgmr.msra.gmra.mxu0 %v588_v14 }
  0x54   :  { %565 = vmatprep.mubr.msk.bf16.mxu0 %vm720_vm0, %v719_v0  ;;  %550 = vmatpush3.bf16.msra.mxu0 %v597_v18 }
  0x55   :  { %551 = vmatprep.subr.bf16.mxu0 %v719_v0 }
  0x58   :  { %552 = vmatpush3.bf16.msra.mxu0 %v598_v19 }
  0x59   :  { %553 = vmatprep.subr.bf16.mxu0 %v719_v0 }
  0x5c   :  { %554 = vmatpush3.bf16.msra.mxu0 %v599_v20 }
  0x5d   :  { %555 = vmatprep.subr.bf16.mxu0 %v719_v0 }
  0x60   :  { %556 = vmatpush3.bf16.msra.mxu0 %v600_v21 }
  0x61   :  { %557 = vmatprep.subr.bf16.mxu0 %v719_v0 }
  0x64   :  { %558 = vmatpush3.bf16.msra.mxu0 %v601_v22 }
  0x65   :  { %559 = vmatprep.subr.bf16.mxu0 %v719_v0 }
  0x68   :  { %560 = vmatpush3.bf16.msra.mxu0 %v602_v33 }
  0x69   :  { %561 = vmatprep.subr.bf16.mxu0 %v719_v0 }
  0x6c   :  { %562 = vmatpush3.bf16.msra.mxu0 %v603_v34 }
  0x6d   :  { %563 = vmatprep.subr.bf16.mxu0 %v719_v0 }
  0x70   :  { %564 = vmatpush3.bf16.msra.mxu0 %v604_v35 }
 0x113   :  { %v196_v24 = vpop.f32.mrf.mxu0 }
 0x114   :  { %v197_v26 = vadd.f32 %v454_v23, %v196_v24 }
 0x115   :  { %v527_v25 = vpop.f32.mrf.mxu0 }
 0x116   :  { %v203_v30 = vmax.f32 %v197_v26, 0.0 }
 0x117   :  { %v199_v27 = vpop.f32.mrf.mxu0 }
 0x118   :  { %v200_v28 = vadd.f32 %v454_v23, %v199_v27 }
 0x119   :  { %v528_v29 = vpop.f32.mrf.mxu0 }
 0x11a   :  { %v204_v31 = vmax.f32 %v200_v28, 0.0 }
 0x11c   :  { %v205_v32 = vpack.c.bf16 %v204_v31, %v203_v30 }
 0x11e   :  { %546 = vmatmul.mubr.bf16.vlgmr.msra.gmra.mxu1 %v205_v32 }
 0x1de   :  { %v311_v37 = vpop.f32.mrf.mxu1 }
 0x1df   :  { %v312_v39 = vadd.f32 %v464_v36, %v311_v37 }
 0x1e0   :  { %v547_v38 = vpop.f32.mrf.mxu1 }
 0x1e1   :  { %v318_v43 = vmax.f32 %v312_v39, 0.0 }
 0x1e2   :  { %v314_v40 = vpop.f32.mrf.mxu1 }
 0x1e3   :  { %v315_v41 = vadd.f32 %v464_v36, %v314_v40 }
 0x1e4   :  { %v548_v42 = vpop.f32.mrf.mxu1 }
 0x1e5   :  { %v319_v44 = vmax.f32 %v315_v41, 0.0 }
 0x1e7   :  { %v320_v45 = vpack.c.bf16 %v319_v44, %v318_v43 }
 0x1e9   :  { %566 = vmatmul.mubr.bf16.vlgmr.msra.gmra.mxu0 %v320_v45 }
 0x2a9   :  { %v426_v47 = vpop.f32.mrf.mxu0 }
 0x2aa   :  { %v427_v48 = vadd.f32 %v473_v46, %v426_v47 }
 0x2ab   :  { %v567_v49 = vpop.f32.mrf.mxu0 }
 0x2ac   :  { %433 = vst [vmem:[#allocation10] sm:$0xff] %v427_v48 }
 0x2ad   :  { %v429_v50 = vpop.f32.mrf.mxu0 }
 0x2ae   :  { %v430_v51 = vadd.f32 %v473_v46, %v429_v50 }
 0x2af   :  { %v568_v52 = vpop.f32.mrf.mxu0 }
 0x2b0   :  { %434 = vst [vmem:[#allocation10 + $0x8] sm:$0xff] %v430_v51 }
 0x2b1   :  { %696 = shalt.err (!%p693_p10)
}
 0x2b2   :  { %s722_s26 = smov 128   ;;  %s723_s6 = smov 8  }
 0x2b3   :  { %446 = dma.vmem_to_hbm [thread:$0]  %s441_s25, 256, %s837_s7, [#allocation4], %s722_s26, %s722_s26, %s723_s6  }
 0x2b4   :  { %711 = dma.done.wait [#allocation4], 256  }
 0x2b5   :  { %712 = vsyncadd [#allocation4], 4294967040 }
 0x2b6   :  { %450 = vsyncpa [#allocation3], 1 }
 0x2b7   :  { %451 = vsyncpa [#allocation6], 1 }
 0x2b8   :  { %452 = vsyncpa [#allocation9], 1 }
 0x2b9   :  { %453 = vsyncpa [#allocation4], 1 }

</bundles_post_ra>
